<compile_context>
chip_gen: v7x
topology: tpu7x:2x2x1
jax: 0.10.0
libtpu: 0.0.40
codegen_flags: <defaults>
</compile_context>

<pallas_src>
import jax
import jax.numpy as jnp
from jax.experimental import pallas as pl
from jax.experimental.pallas import tpu as pltpu

# ----------------------------- "opt" configuration ---------------------------
LABEL_NC = 4                 # opt.label_nc
CONTAIN_DONTCARE = False     # opt.contain_dontcare_label
NO_INSTANCE = False          # opt.no_instance
SEM_NC = LABEL_NC + (1 if CONTAIN_DONTCARE else 0)     # one-hot channels
LAMBDA_KLD = 0.05            # opt.lambda_kld
Z_DIM = 32                   # opt.z_dim

OUT_DTYPE = jnp.bfloat16     # 0/1 exactly representable -> lossless, halves writeback
_SUB = 32                    # H-tile granule: satisfies int8(32)/bf16(16)/f32(8) sublane tiling


# ------------------------------ sizing helpers --------------------------------
def _round_up(x, m):
    return ((x + m - 1) // m) * m


def _vmem_budget_bytes():
    """~75% of this generation's per-core VMEM (v5e/v6e ~96 MiB, v7x ~48 MiB)."""
    try:
        cap = int(getattr(pltpu.get_tpu_info(), "vmem_capacity_bytes", 0))
        if cap > 0:
            return (3 * cap) // 4
    except Exception:
        pass
    return 48 << 20          # conservative fallback (safe on v7x's 64 MiB VMEM)


def _choose_tile_h(B, H, bytes_per_row, budget):
    """Tile height: multiple of 32 whose double-buffered working set stays within
    ~half of the VMEM budget, capped at 512 rows; B == 1 is split into >= 2 tiles
    so both v7x TensorCores get work."""
    cap_rows = int((budget // 2) // max(1, 2 * bytes_per_row))
    cap_rows = max(_SUB, min(512, (cap_rows // _SUB) * _SUB))
    h_pad = _round_up(H, _SUB)
    if h_pad <= cap_rows and (B >= 2 or H < 2 * _SUB):
        return H, 1                                         # single full-height tile
    nt = max(2 if B == 1 else 1, -(-h_pad // cap_rows))     # ceil div; force split at B==1
    th = _round_up(-(-h_pad // nt), _SUB)
    nt = -(-H // th)                                        # tiles actually covering H
    return th, nt


def _build_halos(inst_i32, th, nt):
    """(B, 2, nt, W) int32: [:,0,i] = instance row just above tile i,
    [:,1,i] = instance row just below tile i.  Global top/bottom entries are the
    boundary rows themselves, so they never generate an edge (no extra masks)."""
    plane = inst_i32[:, 0]                                  # (B, H, W)
    if nt == 1:
        above = plane[:, 0:1]
        below = plane[:, -1:]
    else:
        above = jnp.concatenate([plane[:, 0:1], plane[:, th - 1:-1:th]], axis=1)
        below = jnp.concatenate([plane[:, th::th], plane[:, -1:]], axis=1)
    return jnp.stack([above, below], axis=1)                # (B, 2, nt, W)


# ------------------------------- Pallas kernels -------------------------------
def _make_preprocess_kernel(sem_nc, th, w, h_total, nt, with_edge, out_dtype):
    ragged = (nt * th != h_total)       # last H tile is partial (handled in-kernel)

    if not with_edge:
        # no_instance=True: one-hot only -- never touch a non-existent edge channel
        def kernel(label_ref, out_ref):
            lab = label_ref[0, 0]                            # (th, w) int
            for c in range(sem_nc):
                out_ref[0, c] = (lab == c).astype(out_dtype)
        return kernel

    def kernel(label_ref, inst_ref, halo_ref, out_ref):
        # --- one-hot "scatter_" along channels, unrolled per class -------------
        # (no SEM_NC x th x w iota / f32 intermediate; live set is one H x W slab)
        lab = label_ref[0, 0]                                # (th, w) int32/int8
        for c in range(sem_nc):
            out_ref[0, c] = (lab == c).astype(out_dtype)

        # --- instance edge map (get_edges), last output channel ---------------
        i = pl.program_id(1)
        inst = inst_ref[0, 0]                                # (th, w) int32
        lane = jax.lax.broadcasted_iota(jnp.int32, (th, w), 1)
        row = jax.lax.broadcasted_iota(jnp.int32, (th, w), 0)

        # XLU rotations overlap with the VPU compares; wrap-around entries are
        # masked (lane dim) or patched (row dim, via halos / self values) below.
        right = pltpu.roll(inst, w - 1, 1)                   # inst[:, j+1]
        left = pltpu.roll(inst, 1, 1)                        # inst[:, j-1]
        down = pltpu.roll(inst, th - 1, 0)                   # inst[r+1, :]
        up = pltpu.roll(inst, 1, 0)                          # inst[r-1, :]

        # VMEM-resident halo slab (one DMA per batch item, not per grid step).
        up_row = halo_ref[0, 0, pl.ds(i, 1), :]              # (1, w)
        dn_row = halo_ref[0, 1, pl.ds(i, 1), :]              # (1, w)
        up = jnp.where(row == 0, up_row, up)
        down = jnp.where(row == th - 1, dn_row, down)
        if ragged:
            # last *real* row of the (ragged) final tile: "down" neighbour = itself
            last_loc = (h_total - 1) - i * th
            down = jnp.where(row == last_loc, inst, down)

        edge = (((lane < w - 1) & (inst != right))
                | ((lane > 0) & (inst != left))
                | (inst != down)
                | (inst != up))
        out_ref[0, sem_nc] = edge.astype(out_dtype)

    return kernel


# ------------------------------- host wrappers --------------------------------
def preprocess_input_pallas(label_map, inst_map=None, *, no_instance=NO_INSTANCE,
                            out_dtype=OUT_DTYPE, tile_h=None):
    """(B,1,H,W) integer label (+ instance) -> (B, nc(+1), H, W) one-hot (+ edge)."""
    B, _, H, W = label_map.shape
    with_edge = not no_instance
    out_nc = SEM_NC + (1 if with_edge else 0)

    # narrow label dtypes are consumed natively (tile heights are multiples of 32
    # or the full H); anything else falls back to int32
    if label_map.dtype not in (jnp.dtype(jnp.int8), jnp.dtype(jnp.uint8),
                               jnp.dtype(jnp.int32)):
        label_map = label_map.astype(jnp.int32)
    lab_isz = label_map.dtype.itemsize

    budget = _vmem_budget_bytes()
    out_isz = jnp.dtype(out_dtype).itemsize
    bytes_per_row = W * (out_nc * out_isz + lab_isz + (4 if with_edge else 0))
    if tile_h is None:
        th, nt = _choose_tile_h(B, H, bytes_per_row, budget)
    else:
        th = min(int(tile_h), H)
        assert th == H or th % _SUB == 0, "tile_h must be a multiple of 32 (or >= H)"
        nt = -(-H // th)

    kernel = _make_preprocess_kernel(SEM_NC, th, W, H, nt, with_edge, out_dtype)

    lab_spec = pl.BlockSpec((1, 1, th, W), lambda b, i: (b, 0, i, 0))
    out_spec = pl.BlockSpec((1, out_nc, th, W), lambda b, i: (b, 0, i, 0))

    if with_edge:
        if inst_map.dtype != jnp.int32:
            inst_map = inst_map.astype(jnp.int32)
        halos = _build_halos(inst_map, th, nt)               # (B, 2, nt, W), tiny
        in_specs = [
            lab_spec,
            pl.BlockSpec((1, 1, th, W), lambda b, i: (b, 0, i, 0)),
            # halo slab stays VMEM-resident across all H tiles of a batch item
            pl.BlockSpec((1, 2, nt, W), lambda b, i: (b, 0, 0, 0)),
        ]
        args = (label_map, inst_map, halos)
    else:
        in_specs = [lab_spec]
        args = (label_map,)

    return pl.pallas_call(
        kernel,
        out_shape=jax.ShapeDtypeStruct((B, out_nc, H, W), out_dtype),
        grid_spec=pltpu.PrefetchScalarGridSpec(
            num_scalar_prefetch=0,
            grid=(B, nt),
            in_specs=in_specs,
            out_specs=out_spec,
        ),
        # "parallel" on both axes lets the runtime shard grid points across
        # TensorCores on multi-core parts.  (If v7x needs it, the leading axis
        # can be switched to pltpu.CORE_PARALLEL.)
        compiler_params=pltpu.CompilerParams(
            dimension_semantics=("parallel", "parallel"),
            vmem_limit_bytes=int(budget),
        ),
    )(*args)


def reparameterize(mu, logvar, eps):
    # tiny (B, z_dim) elementwise math: plain jnp (a pallas_call launch costs more
    # than the math itself; XLA fuses this with its consumers) -- per perf review.
    return mu + jnp.exp(0.5 * logvar) * eps


def kld_loss(mu, logvar):
    return -0.5 * jnp.sum(1.0 + logvar - jnp.square(mu) - jnp.exp(logvar))


class Pix2PixModelPallas:
    """Pallas/JAX port of the in-file compute of spade/models/pix2pix_model.py."""

    def __init__(self, lambda_kld=LAMBDA_KLD, no_instance=NO_INSTANCE):
        self.lambda_kld = lambda_kld
        self.no_instance = no_instance

    def preprocess_input(self, data):
        input_semantics = preprocess_input_pallas(
            data["label"], data.get("instance"), no_instance=self.no_instance)
        return input_semantics, data.get("image")

    def reparameterize(self, mu, logvar, eps):
        return reparameterize(mu, logvar, eps)

    def KLD_loss(self, mu, logvar):
        return kld_loss(mu, logvar)

    def encode_z_from_moments(self, mu, logvar, eps):
        # encode_z + KLD_loss minus the (external) netE conv trunk
        z = reparameterize(mu, logvar, eps)
        return z, mu, logvar, kld_loss(mu, logvar) * self.lambda_kld

    def forward(self, data, mode):
        input_semantics, real_image = self.preprocess_input(data)
        if mode == "inference":
            # TODO(synk): netG (networks.define_G, the SPADE generator) is external
            #             to this file; only the in-file preprocessing is produced.
            return input_semantics
        raise ValueError("|mode| not supported in the Pallas port "
                         "(generator/discriminator/encode need external netG/netD/netE)")


# ----------------------------- pure-JAX references ----------------------------
def _ref_get_edges(t):
    e = jnp.zeros(t.shape, dtype=bool)
    dw = t[:, :, :, 1:] != t[:, :, :, :-1]
    e = e.at[:, :, :, 1:].set(e[:, :, :, 1:] | dw)
    e = e.at[:, :, :, :-1].set(e[:, :, :, :-1] | dw)
    dh = t[:, :, 1:, :] != t[:, :, :-1, :]
    e = e.at[:, :, 1:, :].set(e[:, :, 1:, :] | dh)
    e = e.at[:, :, :-1, :].set(e[:, :, :-1, :] | dh)
    return e.astype(jnp.float32)


def _ref_semantics(label, instance=None):
    onehot = jnp.transpose(
        jax.nn.one_hot(label[:, 0].astype(jnp.int32), SEM_NC, dtype=jnp.float32),
        (0, 3, 1, 2))
    if instance is None:
        return onehot
    return jnp.concatenate([onehot, _ref_get_edges(instance)], axis=1)


if __name__ == "__main__":
    key = jax.random.PRNGKey(0)
    ks = jax.random.split(key, 10)

    # --- 1. preprocess_input, single full-image tile (one-hot + edges) --------
    B, H, W = 2, 16, 16
    label = jax.random.randint(ks[0], (B, 1, H, W), 0, SEM_NC, dtype=jnp.int32)
    instance = jax.random.randint(ks[1], (B, 1, H, W), 0, 3, dtype=jnp.int32)
    image = jax.random.normal(ks[2], (B, 3, H, W), dtype=jnp.float32)

    model = Pix2PixModelPallas()
    sem, _ = model.preprocess_input({"label": label, "instance": instance, "image": image})
    sem = jax.block_until_ready(sem)
    assert sem.shape == (B, SEM_NC + 1, H, W) and sem.dtype == OUT_DTYPE
    assert jnp.array_equal(sem.astype(jnp.float32), _ref_semantics(label, instance)), \
        "preprocess_input mismatch"

    # --- 2. H-tiled path: B==1 split, resident halos, ragged last tile --------
    B2, H2, W2 = 1, 72, 128            # auto-tiler -> th=64, nt=2, partial last tile
    label2 = jax.random.randint(ks[3], (B2, 1, H2, W2), 0, SEM_NC, dtype=jnp.int32)
    inst2 = jax.random.randint(ks[4], (B2, 1, H2, W2), 0, 3, dtype=jnp.int32)
    sem2 = jax.block_until_ready(preprocess_input_pallas(label2, inst2))
    assert jnp.array_equal(sem2.astype(jnp.float32), _ref_semantics(label2, inst2)), \
        "tiled/ragged preprocess_input mismatch"

    # --- 3. narrow (int8) label map, explicit 32-row tiles ---------------------
    B3, H3, W3 = 1, 64, 128
    label3 = jax.random.randint(ks[5], (B3, 1, H3, W3), 0, SEM_NC, dtype=jnp.int8)
    inst3 = jax.random.randint(ks[6], (B3, 1, H3, W3), 0, 3, dtype=jnp.int32)
    sem3 = jax.block_until_ready(preprocess_input_pallas(label3, inst3, tile_h=32))
    assert jnp.array_equal(sem3.astype(jnp.float32), _ref_semantics(label3, inst3)), \
        "int8-label preprocess_input mismatch"

    # --- 4. no_instance configuration (one-hot only, no edge channel) ----------
    sem4 = jax.block_until_ready(preprocess_input_pallas(label, no_instance=True))
    assert sem4.shape == (B, SEM_NC, H, W)
    assert jnp.array_equal(sem4.astype(jnp.float32), _ref_semantics(label)), \
        "no_instance preprocess_input mismatch"

    # --- 5. reparameterize + KLD (plain jnp; netE conv trunk is external) ------
    mu = jax.random.normal(ks[7], (B, Z_DIM), dtype=jnp.float32)
    logvar = 0.1 * jax.random.normal(ks[8], (B, Z_DIM), dtype=jnp.float32)
    eps = jax.random.normal(ks[9], (B, Z_DIM), dtype=jnp.float32)
    z, _, _, kld_w = model.encode_z_from_moments(mu, logvar, eps)
    z, kld_w = jax.block_until_ready((z, kld_w))
    ref_z = mu + jnp.exp(0.5 * logvar) * eps
    ref_kld = -0.5 * jnp.sum(1.0 + logvar - mu ** 2 - jnp.exp(logvar)) * LAMBDA_KLD
    assert jnp.allclose(z, ref_z, atol=1e-6), "reparameterize mismatch"
    assert jnp.allclose(kld_w, ref_kld, rtol=1e-5, atol=1e-6), "KLD mismatch"

    print("KERNEL_OK")
</pallas_src>

<mosaic_0001>
module attributes {stable_mosaic.version = 11 : i64} {
  func.func @kernel(%arg0: i32, %arg1: i32, %arg2: memref<1x1x16x16xi32, #tpu.memory_space<vmem>>, %arg3: memref<1x1x16x16xi32, #tpu.memory_space<vmem>>, %arg4: memref<1x2x1x16xi32, #tpu.memory_space<vmem>>, %arg5: memref<1x5x16x16xbf16, #tpu.memory_space<vmem>>) attributes {dimension_semantics = [#tpu.dimension_semantics<parallel>, #tpu.dimension_semantics<parallel>], iteration_bounds = array<i64: 2, 1>, scalar_prefetch = 0 : i64, scratch_operands = 0 : i64, tpu.core_type = #tpu.core_type<tc>, window_params = [{transform_indices = @transform_0, window_bounds = array<i64: 1, 1, 16, 16>}, {transform_indices = @transform_1, window_bounds = array<i64: 1, 1, 16, 16>}, {transform_indices = @transform_2, window_bounds = array<i64: 1, 2, 1, 16>}, {transform_indices = @transform_3, window_bounds = array<i64: 1, 5, 16, 16>}]} {
    %c0 = arith.constant 0 : index
    %c0_0 = arith.constant 0 : index
    %c0_1 = arith.constant 0 : index
    %c0_2 = arith.constant 0 : index
    %0 = vector.load %arg2[%c0, %c0_0, %c0_1, %c0_2] : memref<1x1x16x16xi32, #tpu.memory_space<vmem>>, vector<1x1x16x16xi32>
    %1 = vector.shape_cast %0 : vector<1x1x16x16xi32> to vector<16x16xi32>
    %c0_i32 = arith.constant 0 : i32
    %2 = vector.broadcast %c0_i32 : i32 to vector<16x16xi32>
    %3 = arith.cmpi eq, %1, %2 : vector<16x16xi32>
    %4 = arith.extui %3 : vector<16x16xi1> to vector<16x16xi32>
    %5 = arith.sitofp %4 : vector<16x16xi32> to vector<16x16xf32>
    %6 = arith.truncf %5 : vector<16x16xf32> to vector<16x16xbf16>
    %c0_3 = arith.constant 0 : index
    %c0_4 = arith.constant 0 : index
    %c0_5 = arith.constant 0 : index
    %c0_6 = arith.constant 0 : index
    %7 = vector.load %arg5[%c0_3, %c0_4, %c0_5, %c0_6] : memref<1x5x16x16xbf16, #tpu.memory_space<vmem>>, vector<1x1x16x16xbf16>
    %8 = vector.shape_cast %7 : vector<1x1x16x16xbf16> to vector<16x16xbf16>
    %9 = vector.shape_cast %6 : vector<16x16xbf16> to vector<1x1x16x16xbf16>
    tpu.vector_store %arg5[%c0_3, %c0_4, %c0_5, %c0_6], %9 {strides = array<i32>} : memref<1x5x16x16xbf16, #tpu.memory_space<vmem>>, vector<1x1x16x16xbf16>,
    %c1_i32 = arith.constant 1 : i32
    %10 = vector.broadcast %c1_i32 : i32 to vector<16x16xi32>
    %11 = arith.cmpi eq, %1, %10 : vector<16x16xi32>
    %12 = arith.extui %11 : vector<16x16xi1> to vector<16x16xi32>
    %13 = arith.sitofp %12 : vector<16x16xi32> to vector<16x16xf32>
    %14 = arith.truncf %13 : vector<16x16xf32> to vector<16x16xbf16>
    %c0_7 = arith.constant 0 : index
    %c1 = arith.constant 1 : index
    %c0_8 = arith.constant 0 : index
    %c0_9 = arith.constant 0 : index
    %15 = vector.load %arg5[%c0_7, %c1, %c0_8, %c0_9] : memref<1x5x16x16xbf16, #tpu.memory_space<vmem>>, vector<1x1x16x16xbf16>
    %16 = vector.shape_cast %15 : vector<1x1x16x16xbf16> to vector<16x16xbf16>
    %17 = vector.shape_cast %14 : vector<16x16xbf16> to vector<1x1x16x16xbf16>
    tpu.vector_store %arg5[%c0_7, %c1, %c0_8, %c0_9], %17 {strides = array<i32>} : memref<1x5x16x16xbf16, #tpu.memory_space<vmem>>, vector<1x1x16x16xbf16>,
    %c2_i32 = arith.constant 2 : i32
    %18 = vector.broadcast %c2_i32 : i32 to vector<16x16xi32>
    %19 = arith.cmpi eq, %1, %18 : vector<16x16xi32>
    %20 = arith.extui %19 : vector<16x16xi1> to vector<16x16xi32>
    %21 = arith.sitofp %20 : vector<16x16xi32> to vector<16x16xf32>
    %22 = arith.truncf %21 : vector<16x16xf32> to vector<16x16xbf16>
    %c0_10 = arith.constant 0 : index
    %c2 = arith.constant 2 : index
    %c0_11 = arith.constant 0 : index
    %c0_12 = arith.constant 0 : index
    %23 = vector.load %arg5[%c0_10, %c2, %c0_11, %c0_12] : memref<1x5x16x16xbf16, #tpu.memory_space<vmem>>, vector<1x1x16x16xbf16>
    %24 = vector.shape_cast %23 : vector<1x1x16x16xbf16> to vector<16x16xbf16>
    %25 = vector.shape_cast %22 : vector<16x16xbf16> to vector<1x1x16x16xbf16>
    tpu.vector_store %arg5[%c0_10, %c2, %c0_11, %c0_12], %25 {strides = array<i32>} : memref<1x5x16x16xbf16, #tpu.memory_space<vmem>>, vector<1x1x16x16xbf16>,
    %c3_i32 = arith.constant 3 : i32
    %26 = vector.broadcast %c3_i32 : i32 to vector<16x16xi32>
    %27 = arith.cmpi eq, %1, %26 : vector<16x16xi32>
    %28 = arith.extui %27 : vector<16x16xi1> to vector<16x16xi32>
    %29 = arith.sitofp %28 : vector<16x16xi32> to vector<16x16xf32>
    %30 = arith.truncf %29 : vector<16x16xf32> to vector<16x16xbf16>
    %c0_13 = arith.constant 0 : index
    %c3 = arith.constant 3 : index
    %c0_14 = arith.constant 0 : index
    %c0_15 = arith.constant 0 : index
    %31 = vector.load %arg5[%c0_13, %c3, %c0_14, %c0_15] : memref<1x5x16x16xbf16, #tpu.memory_space<vmem>>, vector<1x1x16x16xbf16>
    %32 = vector.shape_cast %31 : vector<1x1x16x16xbf16> to vector<16x16xbf16>
    %33 = vector.shape_cast %30 : vector<16x16xbf16> to vector<1x1x16x16xbf16>
    tpu.vector_store %arg5[%c0_13, %c3, %c0_14, %c0_15], %33 {strides = array<i32>} : memref<1x5x16x16xbf16, #tpu.memory_space<vmem>>, vector<1x1x16x16xbf16>,
    %c0_16 = arith.constant 0 : index
    %c0_17 = arith.constant 0 : index
    %c0_18 = arith.constant 0 : index
    %c0_19 = arith.constant 0 : index
    %34 = vector.load %arg3[%c0_16, %c0_17, %c0_18, %c0_19] : memref<1x1x16x16xi32, #tpu.memory_space<vmem>>, vector<1x1x16x16xi32>
    %35 = vector.shape_cast %34 : vector<1x1x16x16xi32> to vector<16x16xi32>
    %36 = tpu.iota {dimensions = array<i32: 1>} : vector<16x16xi32>
    %37 = tpu.iota {dimensions = array<i32: 0>} : vector<16x16xi32>
    %c15_i32 = arith.constant 15 : i32
    %38 = tpu.dynamic_rotate %35 by %c15_i32 dim 1 : vector<16x16xi32>, i32 -> vector<16x16xi32>
    %c1_i32_20 = arith.constant 1 : i32
    %39 = tpu.dynamic_rotate %35 by %c1_i32_20 dim 1 : vector<16x16xi32>, i32 -> vector<16x16xi32>
    %c15_i32_21 = arith.constant 15 : i32
    %40 = tpu.dynamic_rotate %35 by %c15_i32_21 dim 0 : vector<16x16xi32>, i32 -> vector<16x16xi32>
    %c1_i32_22 = arith.constant 1 : i32
    %41 = tpu.dynamic_rotate %35 by %c1_i32_22 dim 0 : vector<16x16xi32>, i32 -> vector<16x16xi32>
    %c0_23 = arith.constant 0 : index
    %c0_24 = arith.constant 0 : index
    %42 = arith.index_cast %arg1 : i32 to index
    %c0_25 = arith.constant 0 : index
    %43 = vector.load %arg4[%c0_23, %c0_24, %42, %c0_25] : memref<1x2x1x16xi32, #tpu.memory_space<vmem>>, vector<1x1x1x16xi32>
    %44 = vector.shape_cast %43 : vector<1x1x1x16xi32> to vector<1x16xi32>
    %c0_26 = arith.constant 0 : index
    %c1_27 = arith.constant 1 : index
    %45 = arith.index_cast %arg1 : i32 to index
    %c0_28 = arith.constant 0 : index
    %46 = vector.load %arg4[%c0_26, %c1_27, %45, %c0_28] : memref<1x2x1x16xi32, #tpu.memory_space<vmem>>, vector<1x1x1x16xi32>
    %47 = vector.shape_cast %46 : vector<1x1x1x16xi32> to vector<1x16xi32>
    %c0_i32_29 = arith.constant 0 : i32
    %48 = vector.broadcast %c0_i32_29 : i32 to vector<16x16xi32>
    %49 = arith.cmpi eq, %37, %48 : vector<16x16xi32>
    %50 = vector.shape_cast %44 : vector<1x16xi32> to vector<1x16xi32>
    %51 = vector.broadcast %50 : vector<1x16xi32> to vector<16x16xi32>
    %52 = arith.select %49, %51, %41 : vector<16x16xi1>, vector<16x16xi32>
    %c15_i32_30 = arith.constant 15 : i32
    %53 = vector.broadcast %c15_i32_30 : i32 to vector<16x16xi32>
    %54 = arith.cmpi eq, %37, %53 : vector<16x16xi32>
    %55 = vector.shape_cast %47 : vector<1x16xi32> to vector<1x16xi32>
    %56 = vector.broadcast %55 : vector<1x16xi32> to vector<16x16xi32>
    %57 = arith.select %54, %56, %40 : vector<16x16xi1>, vector<16x16xi32>
    %c15_i32_31 = arith.constant 15 : i32
    %58 = vector.broadcast %c15_i32_31 : i32 to vector<16x16xi32>
    %59 = arith.cmpi slt, %36, %58 : vector<16x16xi32>
    %60 = arith.cmpi ne, %35, %38 : vector<16x16xi32>
    %61 = arith.andi %59, %60 : vector<16x16xi1>
    %c0_i32_32 = arith.constant 0 : i32
    %62 = vector.broadcast %c0_i32_32 : i32 to vector<16x16xi32>
    %63 = arith.cmpi sgt, %36, %62 : vector<16x16xi32>
    %64 = arith.cmpi ne, %35, %39 : vector<16x16xi32>
    %65 = arith.andi %63, %64 : vector<16x16xi1>
    %66 = arith.ori %61, %65 : vector<16x16xi1>
    %67 = arith.cmpi ne, %35, %57 : vector<16x16xi32>
    %68 = arith.ori %66, %67 : vector<16x16xi1>
    %69 = arith.cmpi ne, %35, %52 : vector<16x16xi32>
    %70 = arith.ori %68, %69 : vector<16x16xi1>
    %71 = arith.extui %70 : vector<16x16xi1> to vector<16x16xi32>
    %72 = arith.sitofp %71 : vector<16x16xi32> to vector<16x16xf32>
    %73 = arith.truncf %72 : vector<16x16xf32> to vector<16x16xbf16>
    %c0_33 = arith.constant 0 : index
    %c4 = arith.constant 4 : index
    %c0_34 = arith.constant 0 : index
    %c0_35 = arith.constant 0 : index
    %74 = vector.load %arg5[%c0_33, %c4, %c0_34, %c0_35] : memref<1x5x16x16xbf16, #tpu.memory_space<vmem>>, vector<1x1x16x16xbf16>
    %75 = vector.shape_cast %74 : vector<1x1x16x16xbf16> to vector<16x16xbf16>
    %76 = vector.shape_cast %73 : vector<16x16xbf16> to vector<1x1x16x16xbf16>
    tpu.vector_store %arg5[%c0_33, %c4, %c0_34, %c0_35], %76 {strides = array<i32>} : memref<1x5x16x16xbf16, #tpu.memory_space<vmem>>, vector<1x1x16x16xbf16>,
    return
  }
  func.func @transform_0(%arg0: i32, %arg1: i32) -> (i32, i32, i32, i32) {
    %c0_i32 = arith.constant 0 : i32
    %c0_i32_0 = arith.constant 0 : i32
    %c0_i32_1 = arith.constant 0 : i32
    return %arg0, %c0_i32, %arg1, %c0_i32_0 : i32, i32, i32, i32
  }
  func.func @transform_1(%arg0: i32, %arg1: i32) -> (i32, i32, i32, i32) {
    %c0_i32 = arith.constant 0 : i32
    %c0_i32_0 = arith.constant 0 : i32
    %c0_i32_1 = arith.constant 0 : i32
    return %arg0, %c0_i32, %arg1, %c0_i32_0 : i32, i32, i32, i32
  }
  func.func @transform_2(%arg0: i32, %arg1: i32) -> (i32, i32, i32, i32) {
    %c0_i32 = arith.constant 0 : i32
    %c0_i32_0 = arith.constant 0 : i32
    %c0_i32_1 = arith.constant 0 : i32
    %c0_i32_2 = arith.constant 0 : i32
    return %arg0, %c0_i32, %c0_i32_0, %c0_i32_1 : i32, i32, i32, i32
  }
  func.func @transform_3(%arg0: i32, %arg1: i32) -> (i32, i32, i32, i32) {
    %c0_i32 = arith.constant 0 : i32
    %c0_i32_0 = arith.constant 0 : i32
    %c0_i32_1 = arith.constant 0 : i32
    return %arg0, %c0_i32, %arg1, %c0_i32_0 : i32, i32, i32, i32
  }
}

</mosaic_0001>

<bundles_post_ra>
// kernel: tpu_custom_call.1
= control target key start
LH: loop header
LB: loop body
LE: loop exit
PB: predicated region body
PF: predicated region fallthrough
CT: control target
= control target key end

     0   :  { %8 = vsyncpa [#allocation3], 0  ;;  %s1206_s0 = inlined_call_operand.hbm [shape: s32[2,1,16,16], index: 0, kind: input, shape index: {}]   ;;  %s1207_s1 = inlined_call_operand.hbm [shape: s32[2,1,16,16], index: 1, kind: input, shape index: {}]   ;;  %s1208_s2 = inlined_call_operand.vmem [shape: s32[2,2,1,16], index: 2, kind: input, shape index: {}]   ;;  %s1209_s3 = inlined_call_operand.hbm [shape: bf16[2,5,16,16], index: 3, kind: output, shape index: {}]  }
   0x1   :  { %10 = vsyncpa [#allocation3 + $0x1], 0 }
   0x2   :  { %11 = vsyncpa [#allocation6], 0 }
   0x3   :  { %13 = vsyncpa [#allocation6 + $0x1], 0 }
   0x4   :  { %14 = vsyncpa [#allocation4], 0 }
   0x5   :  { %16 = vsyncpa [#allocation4 + $0x1], 0  ;;  %s895_s12 = smov 0   ;;  %s897_s13 = smov 0  }
   0x6   :  { %s899_s14 = smov 0   ;;  %s901_s15 = smov 0  }
   0x7   :  { %s903_s16 = smov 0   ;;  %s905_s17 = smov 0  }
   0x8 LB: > { %s579_s18 = sadd.s32 4294967295, %s862_s17   ;;  %s580_s19 = sadd.s32 4294967294, %s862_s17   ;;  %s862_s17 = sphi %s905_s17, %s22_s17   ;;  %s858_s16 = sphi %s903_s16, %s1229_s16   ;;  %s854_s15 = sphi %s901_s15, %s1228_s15   ;;  %s850_s14 = sphi %s899_s14, %s1227_s14   ;;  %s846_s13 = sphi %s897_s13, %s1226_s13   ;;  %s842_s12 = sphi %s895_s12, %s1225_s12  }
   0x9   : > { %s34_s20 = sadd.s32 1, %s858_s16  ;;  %s43_s21 = sadd.s32 1, %s850_s14 }
   0xa   : > { %p36_p0 = scmp.ge.s32.totalorder %s34_s20, 2  ;;  %p50_p1 = scmp.ne.s32.totalorder %s850_s14, %s846_s13 }
   0xb   : > { %p51_p2 = scmp.eq.s32.totalorder %s862_s17, 0  ;;  %p56_p3 = scmp.ne.s32.totalorder %s846_s13, %s842_s12 }
   0xc   : > { %s1231_s20 = smov (%p36_p0, %s34_s20), 0  ;;  %p57_p5 = scmp.eq.s32.totalorder %s579_s18, 0 }
   0xd   : > { %p936_p4 = por %p51_p2, %p50_p1  ;;  %s38_s23 = ssub.s32 %s858_s16, %s1231_s20 }
   0xe   : > { %p136_p6 = scmp.eq.s32.totalorder %s579_s18, 1  ;;  %p41_p7 = scmp.eq.s32.totalorder %s38_s23, 0 }
   0xf   : > { %p942_p8 = por %p57_p5, %p56_p3  ;;  %p142_p10 = scmp.eq.s32.totalorder %s580_s19, 1 }
  0x10   : > { %p946_p9 = por %p136_p6, %p50_p1  ;;  %p658_p13 = scmp.lt.s32.totalorder %s862_s17, 2 }
  0x11   : > { %s1213_s24 = scalar_select %p942_p8, 1, 0 }
  0x12   : > { %s1214_s25 = scalar_select %p946_p9, 1, 0 }
  0x13   : > { %s951_s26 = scalar_select %p41_p7, %s850_s14, %s43_s21  }
  0x14   : > { %p953_p11 = por %p142_p10, %p56_p3  ;;  %s960_s28 = sand.u32 1, %s850_s14  }
  0x15   : > { %s583_s29 = sshll.u32 %s960_s28, 4  ;;  %s627_s30 = sshll.u32 %s858_s16, 8 }
  0x16   : > { %s1215_s27 = scalar_select %p953_p11, 1, 0 }
  0x17   : > { %s969_s6 = scalar_lea.hbm %s1206_s0, %s627_s30  ;;  %s166_s7 = scalar_lea.vmem [#allocation2], %s583_s29 }
  0x18   : > { %s175_s8 = sshll.u32 %s166_s7, 4  ;;  %p977_p0 = pnand %p658_p13, %p936_p4  ;;  %s973_s8 = int_to_ptr.vmem [resolvable:$true] %s175_s8 }
  0x19   : > { %s163_s10 = scalar_lea.sflag [#allocation3], %s960_s28  ;;  %s716_s11 = scalar_lea.hbm %s969_s6, 256 }
  0x1a   : > { %p717_p2 = scmp.ne.s32.totalorder %s969_s6, %s716_s11  ;;  %p718_p3 = pneg %p977_p0 }
  0x1b   : > { %s721_s21 = scalar_lea.hbm %s1206_s0, 512  ;;  %p722_p4 = scmp.lt.u32.totalorder %s969_s6, %s1206_s0 }
  0x1c   : > { %p719_p5 = pnand %p718_p3, %p717_p2  ;;  %p723_p7 = scmp.lt.u32.totalorder %s721_s21, %s716_s11 }
  0x1d   : > { %p725_p13 = scmp.lt.u32.totalorder %s716_s11, %s969_s6 }
  0x1e   : > { %p720_p6 = pneg %p719_p5  ;;  %p724_p10 = por %p723_p7, %p722_p4 }
  0x20   : > { %p726_p12 = por %p725_p13, %p724_p10 }
  0x22   : > { %p727_p1 = pnand %p726_p12, %p720_p6 }
  0x24   : > { %730 = shalt.err (!%p727_p1)
}
  0x25   : > { %s731_s4 = scalar_lea.vmem %s973_s8, 256  ;;  %s864_s5 = smov [#allocation2]  }
  0x26   : > { %p732_p2 = scmp.ne.s32.totalorder %s973_s8, %s731_s4  ;;  %s736_s7 = sshll.u32 %s864_s5, 4  ;;  %s737_s7 = int_to_ptr.vmem [resolvable:$false] %s736_s7 }
  0x27   : > { %s738_s18 = scalar_lea.vmem %s737_s7, 512  ;;  %p739_p9 = scmp.lt.s32.totalorder %s973_s8, %s737_s7 }
  0x28   : > { %p734_p5 = pnand %p732_p2, %p718_p3  ;;  %p740_p4 = scmp.lt.s32.totalorder %s738_s18, %s731_s4 }
  0x2a   : > { %p735_p11 = pneg %p734_p5  ;;  %p741_p7 = por %p740_p4, %p739_p9 }
  0x2c   : > { %p742_p10 = pnand %p741_p7, %p735_p11 }
  0x2e   : > { %745 = shalt.err (!%p742_p10)
}
  0x2f   : > { %s865_s11 = smov 128   ;;  %s866_s19 = smov 8  }
  0x30   : > { %650 = dma.hbm_to_vmem [thread:$0]  (!%p977_p0), %s969_s6, 256, %s973_s8, %s163_s10, %s865_s11, %s865_s11, %s866_s19  }
  0x31   : > { %p213_p9 = scmp.lt.s32.totalorder %s862_s17, 3  ;;  %s1019_s23 = scalar_lea.hbm %s1207_s1, %s627_s30 }
  0x32   : > { %p1217_p11 = scmp.ge.s32.totalorder %s862_s17, 1  ;;  %s189_s5 = scalar_lea.vmem [#allocation5], %s583_s29 }
  0x33   : > { %s198_s7 = sshll.u32 %s189_s5, 4  ;;  %s186_s6 = scalar_lea.sflag [#allocation6], %s960_s28  ;;  %s1029_s7 = int_to_ptr.vmem [resolvable:$true] %s198_s7 }
  0x34   : > { %p1023_p12 = pnand %p1217_p11, %p213_p9  ;;  %s746_s8 = scalar_lea.hbm %s1019_s23, 256 }
  0x35   : > { %p747_p1 = scmp.ne.s32.totalorder %s1019_s23, %s746_s8  ;;  %s751_s18 = scalar_lea.hbm %s1207_s1, 512 }
  0x36   : > { %p752_p2 = scmp.lt.u32.totalorder %s1019_s23, %s1207_s1  ;;  %p753_p5 = scmp.lt.u32.totalorder %s751_s18, %s746_s8 }
  0x37   : > { %p749_p6 = pnand %p747_p1, %p718_p3  ;;  %p755_p7 = scmp.lt.u32.totalorder %s746_s8, %s1019_s23 }
  0x38   : > { %p754_p4 = por %p753_p5, %p752_p2 }
  0x39   : > { %p750_p13 = pneg %p749_p6 }
  0x3a   : > { %p756_p10 = por %p755_p7, %p754_p4 }
  0x3c   : > { %p757_p9 = pnand %p756_p10, %p750_p13 }
  0x3e   : > { %760 = shalt.err (!%p757_p9)
}
  0x3f   : > { %s761_s29 = scalar_lea.vmem %s1029_s7, 256  ;;  %s867_s5 = smov [#allocation5]  }
  0x40   : > { %p762_p11 = scmp.ne.s32.totalorder %s1029_s7, %s761_s29  ;;  %s766_s30 = sshll.u32 %s867_s5, 4  ;;  %s767_s30 = int_to_ptr.vmem [resolvable:$false] %s766_s30 }
  0x41   : > { %s768_s10 = scalar_lea.vmem %s767_s30, 512  ;;  %p769_p8 = scmp.lt.s32.totalorder %s1029_s7, %s767_s30 }
  0x42   : > { %p764_p1 = pnand %p762_p11, %p718_p3  ;;  %p770_p2 = scmp.lt.s32.totalorder %s768_s10, %s761_s29 }
  0x44   : > { %p765_p6 = pneg %p764_p1  ;;  %p771_p5 = por %p770_p2, %p769_p8 }
  0x46   : > { %p772_p4 = pnand %p771_p5, %p765_p6 }
  0x48   : > { %775 = shalt.err (!%p772_p4)
}
  0x49   : > { %653 = dma.hbm_to_vmem [thread:$0]  (!%p977_p0), %s1019_s23, 256, %s1029_s7, %s186_s6, %s865_s11, %s865_s11, %s866_s19  }
  0x4a   : > { %217 = sbr.rel (%p1023_p12) target bundleno = 464 (0x1d0), region = 32  ;;  %s1063_s8 = sand.u32 (!%p1023_p12), 1, %s846_s13  }
  0x4b   : > { %s590_s18 = sshll.u32 (!%p1023_p12), %s1063_s8, 4  ;;  %s220_s21 = scalar_lea.sflag (!%p1023_p12), [#allocation3], %s1063_s8 }
  0x4c   : > { %s223_s9 = scalar_lea.vmem (!%p1023_p12), [#allocation2], %s590_s18  ;;  %p1219_p8 = scmp.ne.s32.totalorder (!%p1023_p12), %s1213_s24, 0 }
  0x51   : > { %829 = dma.done.wait (%p1219_p8), %s220_s21, 256  }
  0x52   : > { %831 = vsyncadd (%p1219_p8), %s220_s21, 4294967040  ;;  %s229_s28 = scalar_lea.sflag [#allocation6], %s1063_s8  ;;  %s232_s11 = scalar_lea.vmem [#allocation5], %s590_s18 }
  0x53   : > { %833 = dma.done.wait (%p1219_p8), %s229_s28, 256  }
  0x54   : > { %835 = vsyncadd (%p1219_p8), %s229_s28, 4294967040  ;;  %v1076_v0 = vld [vmem:[%s232_s11] sm:$0xff]  ;;  %s868_s19 = smov 16   ;;  %v1079_v1 = vld [vmem:[%s232_s11 + $0x8] sm:$0xff]  ;;  %vm348_vm0 = vcmask 1047680   ;;  %s639_s24 = smul.u32 40, %s1063_s8  ;;  %v343_v29 = vlaneseq }
  0x55   : > { %349 = vrot.lane.b32.xlu0 %v1076_v0, %s868_s19  ;;  %vm287_vm1 = vcmask 125952   ;;  %v271_v6 = vld [vmem:[%s223_s9] sm:$0xff]  ;;  %v272_v7 = vld [vmem:[%s223_s9 + $0x8] sm:$0xff]  ;;  %v869_v8 = vmov 0.0   ;;  %s870_s4 = smov 127   ;;  %s871_s7 = smov 113  }
  0x56   : > { %vm273_vm2 = vcmp.eq.s32.totalorder %v271_v6, 0  ;;  %vm274_vm3 = vcmp.eq.s32.totalorder %v272_v7, 0  ;;  %vm290_vm4 = vcmp.eq.s32.totalorder %v271_v6, 1  ;;  %vm291_vm5 = vcmp.eq.s32.totalorder %v272_v7, 1  ;;  %s1095_s23 = scalar_lea.vmem [#allocation7], %s639_s24  ;;  %p266_p0 = scmp.lt.s32.totalorder %s854_s15, 1 }
  0x57   : > { %v593_v9 = vsel %vm273_vm2, 1.0, %v869_v8  ;;  %v594_v10 = vsel %vm274_vm3, 1.0, %v869_v8  ;;  %v597_v11 = vsel %vm290_vm4, 1.0, %v869_v8  ;;  %v598_v12 = vsel %vm291_vm5, 1.0, %v869_v8  ;;  %s640_s10 = smul.u32 640, %s854_s15  ;;  %s451_s18 = sshll.u32 %s1095_s23, 4  ;;  %s1155_s18 = int_to_ptr.vmem [resolvable:$true] %s451_s18 }
  0x58   : > { %v629_v13 = vpack.c.bf16 %v593_v9, %v593_v9  ;;  %v630_v14 = vpack.c.bf16 %v594_v10, %v594_v10  ;;  %v631_v15 = vpack.c.bf16 %v597_v11, %v597_v11  ;;  %v632_v16 = vpack.c.bf16 %v598_v12, %v598_v12  ;;  %s267_s6 = scalar_select %p266_p0, %s854_s15, 1 }
  0x59   : > { %352 = vrot.lane.b32.xlu0 %v1079_v1, %s868_s19  ;;  %vm307_vm6 = vcmp.eq.s32.totalorder %v271_v6, 2  ;;  %vm308_vm7 = vcmp.eq.s32.totalorder %v272_v7, 2  ;;  %vm324_vm8 = vcmp.eq.s32.totalorder %v271_v6, 3  ;;  %vm325_vm9 = vcmp.eq.s32.totalorder %v272_v7, 3  ;;  %s1153_s28 = scalar_lea.hbm %s1209_s3, %s640_s10  ;;  %s436_s15 = scalar_lea.sflag [#allocation4], %s1063_s8 }
  0x5a   : > { %v603_v18 = vsel %vm307_vm6, 1.0, %v869_v8  ;;  %v604_v19 = vsel %vm308_vm7, 1.0, %v869_v8  ;;  %v609_v20 = vsel %vm324_vm8, 1.0, %v869_v8  ;;  %v610_v21 = vsel %vm325_vm9, 1.0, %v869_v8  ;;  %288 = vst.msk [vmem:[%s1095_s23] sm:$0xf] %vm287_vm1, %v629_v13 }
  0x5b   : > { %289 = vst.msk [vmem:[%s1095_s23 + $0x4] sm:$0xf] %vm287_vm1, %v630_v14  ;;  %601 = vst.msk [vmem:[%s1095_s23 + $0x8] sm:$0xf] %vm287_vm1, %v631_v15  ;;  %v633_v23 = vpack.c.bf16 %v603_v18, %v603_v18  ;;  %v634_v24 = vpack.c.bf16 %v604_v19, %v604_v19  ;;  %v635_v25 = vpack.c.bf16 %v609_v20, %v609_v20  ;;  %v346_v30 = vshrl.u32 %v343_v29, 7  ;;  %s592_s22 = sshll.u32 %s267_s6, 1 }
  0x5c   : > { %602 = vst.msk [vmem:[%s1095_s23 + $0xc] sm:$0xf] %vm287_vm1, %v632_v16  ;;  %v636_v26 = vpack.c.bf16 %v610_v21, %v610_v21  ;;  %v367_v31 = vrot.slane %v1079_v1, 7  ;;  %v366_v32 = vrot.slane %v1076_v0, 7  ;;  %v344_v33 = vand.u32 127, %v343_v29  ;;  %s269_s30 = scalar_lea.vmem %s1208_s2, %s592_s22  ;;  %s776_s11 = scalar_lea.vmem %s1155_s18, 640 }
  0x5d   : > { %607 = vst.msk [vmem:[%s1095_s23 + $0x10] sm:$0xf] %vm287_vm1, %v633_v23  ;;  %608 = vst.msk [vmem:[%s1095_s23 + $0x14] sm:$0xf] %vm287_vm1, %v634_v24  ;;  %vm368_vm10 = vcmp.lt.s32.totalorder %v346_v30, 1  ;;  %v362_v34 = vrot.slane %v1079_v1, 1  ;;  %p777_p3 = scmp.ne.s32.totalorder %s1155_s18, %s776_s11 }
  0x5e   : > { %613 = vst.msk [vmem:[%s1095_s23 + $0x18] sm:$0xf] %vm287_vm1, %v635_v25  ;;  %614 = vst.msk [vmem:[%s1095_s23 + $0x1c] sm:$0xf] %vm287_vm1, %v636_v26  ;;  %v361_v35 = vrot.slane %v1076_v0, 1  ;;  %vm363_vm11 = vcmp.lt.s32.totalorder %v346_v30, 7  ;;  %v370_v39 = vsel %vm368_vm10, %v367_v31, %v366_v32  ;;  %v369_v49 = vsel %vm368_vm10, %v366_v32, %v367_v31 }
  0x5f   : > { %v347_v37 = vadd.s32 8, %v346_v30  ;;  %v616_v38 = vld [vmem:[%s269_s30] ss:$0 sm:$0xff]  ;;  %vm376_vm12 = vcmp.eq.s32.totalorder %v346_v30, 0  ;;  %vm392_vm13 = vcmp.lt.s32.totalorder %v344_v33, 15  ;;  %vm401_vm15 = vcmp.gt.s32.totalorder %v344_v33, 0 }
  0x60   : > { %v364_v40 = vsel %vm363_vm11, %v361_v35, %v362_v34  ;;  %v382_v43 = vsel %vm376_vm12, %v616_v38, %v370_v39  ;;  %v617_v44 = vld [vmem:[%s269_s30 + $0x1] ss:$0 sm:$0xff]  ;;  %v365_v45 = vsel %vm363_vm11, %v362_v34, %v361_v35  ;;  %p1222_p12 = scmp.ne.s32.totalorder %s1214_s25, 0 }
  0x61   : > { %vm412_vm6 = vcmp.ne.s32.totalorder %v1076_v0, %v364_v40  ;;  %vm416_vm8 = vcmp.ne.s32.totalorder %v1076_v0, %v382_v43 }
  0x62   : > { %p778_p13 = pnand %p777_p3, %p1222_p12 }
  0x64   : > { %p779_p7 = pneg %p778_p13 }
  0xc7   : > { %v350_v2 = vpop.permute.xlu0 %349 }
  0xc8   : > { %v351_v3 = vsel %vm348_vm0, %v350_v2, %v1076_v0 }
  0xc9   : > { %355 = vrot.lane.b32.xlu1 %v351_v3, %s868_s19 }
  0xcb   : > { %v353_v4 = vpop.permute.xlu0 %352 }
  0xcc   : > { %v354_v5 = vsel %vm348_vm0, %v353_v4, %v1079_v1 }
  0xcd   : > { %357 = vrot.lane.b32.xlu1 %v354_v5, %s868_s19  ;;  %s872_s19 = smov [#allocation7]  }
  0xce   : > { %s780_s24 = sshll.u32 %s872_s19, 4  ;;  %s781_s24 = int_to_ptr.vmem [resolvable:$false] %s780_s24 }
  0xcf   : > { %p783_p10 = scmp.lt.s32.totalorder %s1155_s18, %s781_s24 }
 0x13b   : > { %v356_v17 = vpop.permute.xlu1 %355 }
 0x13c   : > { %v359_v22 = vsel %vm348_vm0, %v356_v17, %v1076_v0 }
 0x13d   : > { %393 = vrot.lane.b32.xlu0 %v359_v22, %s870_s4 }
 0x13f   : > { %v358_v27 = vpop.permute.xlu1 %357 }
 0x140   : > { %v360_v28 = vsel %vm348_vm0, %v358_v27, %v1079_v1  ;;  %vm385_vm0 = vcmp.eq.s32.totalorder %v347_v37, 15 }
 0x141   : > { %402 = vrot.lane.b32.xlu0 %v359_v22, %s871_s7  ;;  %395 = vrot.lane.b32.xlu1 %v360_v28, %s870_s4  ;;  %v391_v47 = vsel %vm385_vm0, %v617_v44, %v365_v45  ;;  %s782_s4 = scalar_lea.vmem %s781_s24, 1280 }
 0x142   : > { %p784_p9 = scmp.lt.s32.totalorder %s782_s4, %s776_s11 }
 0x144   : > { %p785_p11 = por %p784_p9, %p783_p10 }
 0x145   : > { %404 = vrot.lane.b32.xlu1 %v360_v28, %s871_s7 }
 0x146   : > { %p786_p1 = pnand %p785_p11, %p779_p7 }
 0x1af   : > { %v394_v36 = vpop.permute.xlu0 %393 }
 0x1b0   : > { %vm397_vm14 = vcmp.ne.s32.totalorder %v1076_v0, %v394_v36 }
 0x1b1   : > { %vm399_vm2 = vmand %vm392_vm13, %vm397_vm14  ;;  %vm413_vm14 = vcmp.ne.s32.totalorder %v1079_v1, %v391_v47 }
 0x1b3   : > { %v396_v41 = vpop.permute.xlu1 %395  ;;  %v403_v42 = vpop.permute.xlu0 %402 }
 0x1b4   : > { %vm398_vm3 = vcmp.ne.s32.totalorder %v1079_v1, %v396_v41  ;;  %vm406_vm4 = vcmp.ne.s32.totalorder %v1076_v0, %v403_v42 }
 0x1b5   : > { %vm1130_vm5 = vmand %vm392_vm13, %vm398_vm3 }
 0x1b6   : > { %vm408_vm7 = vmand %vm401_vm15, %vm406_vm4  ;;  %vm417_vm4 = vcmp.ne.s32.totalorder %v1079_v1, %v369_v49 }
 0x1b7   : > { %vm410_vm9 = vmor %vm399_vm2, %vm408_vm7  ;;  %v405_v48 = vpop.permute.xlu1 %404 }
 0x1b8   : > { %vm414_vm11 = vmor %vm410_vm9, %vm412_vm6  ;;  %vm407_vm12 = vcmp.ne.s32.totalorder %v1079_v1, %v405_v48 }
 0x1b9   : > { %vm418_vm13 = vmor %vm414_vm11, %vm416_vm8 }
 0x1ba   : > { %v618_v50 = vsel %vm418_vm13, 1.0, %v869_v8  ;;  %vm409_vm3 = vmand %vm401_vm15, %vm407_vm12 }
 0x1bb   : > { %v637_v51 = vpack.c.bf16 %v618_v50, %v618_v50  ;;  %vm411_vm10 = vmor %vm1130_vm5, %vm409_vm3 }
 0x1bc   : > { %vm415_vm0 = vmor %vm411_vm10, %vm413_vm14 }
 0x1bd   : > { %622 = vst.msk [vmem:[%s1095_s23 + $0x20] sm:$0xf] %vm287_vm1, %v637_v51  ;;  %vm419_vm2 = vmor %vm415_vm0, %vm417_vm4 }
 0x1be   : > { %v619_v52 = vsel %vm419_vm2, 1.0, %v869_v8 }
 0x1bf   : > { %v638_v53 = vpack.c.bf16 %v619_v52, %v619_v52 }
 0x1c1   : > { %623 = vst.msk [vmem:[%s1095_s23 + $0x24] sm:$0xf] %vm287_vm1, %v638_v53 }
 0x1c2   : > { %789 = shalt.err (!%p786_p1)
}
 0x1c3   : > { %s790_s23 = scalar_lea.hbm %s1153_s28, 640  ;;  %s794_s22 = scalar_lea.hbm %s1209_s3, 1280 }
 0x1c4   : > { %p791_p6 = scmp.ne.s32.totalorder %s1153_s28, %s790_s23  ;;  %p795_p4 = scmp.lt.u32.totalorder %s1153_s28, %s1209_s3 }
 0x1c5   : > { %p796_p8 = scmp.lt.u32.totalorder %s794_s22, %s790_s23  ;;  %p798_p3 = scmp.lt.u32.totalorder %s790_s23, %s1153_s28 }
 0x1c6   : > { %p792_p2 = pnand %p791_p6, %p1222_p12 }
 0x1c7   : > { %p797_p0 = por %p796_p8, %p795_p4 }
 0x1c8   : > { %p793_p5 = pneg %p792_p2 }
 0x1c9   : > { %p799_p13 = por %p798_p3, %p797_p0 }
 0x1cb   : > { %p800_p7 = pnand %p799_p13, %p793_p5 }
 0x1cd   : > { %803 = shalt.err (!%p800_p7)
}
 0x1ce   : > { %s873_s30 = smov 64   ;;  %s874_s10 = smov 4  }
 0x1cf   : > { %645 = dma.vmem_to_hbm [thread:$0]  (%p1222_p12), %s1155_s18, 640, %s1153_s28, %s436_s15, %s873_s30, %s873_s30, %s874_s10  }
 0x1d0 PF: > { %s466_s21 = sand.u32 1, %s842_s12   ;;  %p1223_p10 = scmp.ne.s32.totalorder %s1215_s27, 0 }
 0x1d1   : > { %p1224_p9 = scmp.ge.s32.totalorder %s862_s17, 2  ;;  %s467_s9 = scalar_lea.sflag [#allocation4], %s466_s21 }
 0x1d3   : > { %p655_p11 = pnand %p1224_p9, %p1223_p10 }
 0x1d5   : > { %837 = dma.done.wait (!%p655_p11), %s467_s9, 640  }
 0x1d6   : > { %839 = vsyncadd (!%p655_p11), %s467_s9, 4294966656  ;;  %s22_s17 = sadd.s32 1, %s862_s17   ;;  %s1225_s12 = smov %s846_s13 }
 0x1d7   : > { %p19_p1 = scmp.ge.s32.totalorder %s22_s17, 4   ;;  %s1226_s13 = smov %s850_s14 }
 0x1d8   : > { %s1227_s14 = smov %s951_s26  ;;  %s1228_s15 = smov %s858_s16 }
 0x1d9   : > { %s1229_s16 = smov %s1231_s20  ;;  %21 = sbr.rel (!%p19_p1) target bundleno = 8 (0x8), region = 99 }
 0x1e0   :  { %472 = vsyncpa [#allocation3], 1 }
 0x1e1   :  { %474 = vsyncpa [#allocation3 + $0x1], 1 }
 0x1e2   :  { %475 = vsyncpa [#allocation6], 1 }
 0x1e3   :  { %477 = vsyncpa [#allocation6 + $0x1], 1 }
 0x1e4   :  { %478 = vsyncpa [#allocation4], 1 }
 0x1e5   :  { %480 = vsyncpa [#allocation4 + $0x1], 1 }

</bundles_post_ra>
